<compile_context>
chip_gen: v7x
topology: tpu7x:2x2x1
jax: 0.10.0
libtpu: 0.0.40
codegen_flags: <defaults>
</compile_context>

<pallas_src>
import jax
import jax.numpy as jnp
from jax.experimental import pallas as pl
from jax.experimental.pallas import tpu as pltpu


def _mha_weights_kernel(qh_ref, kT_ref, vh_ref, qres_ref, mask_ref,
                        woh_ref, bo_ref, out_ref, attn_ref):
    """One (batch, query-tile) step over the full key length; emits out + attn."""
    f32 = jnp.float32
    qh = qh_ref[0]                       # (H, TQ, Dh) bf16, 1/sqrt(Dh) pre-folded
    kT = kT_ref[0]                       # (H, Dh, Lk) bf16 (pre-transposed)
    vh = vh_ref[0]                       # (H, Lk, Dh) bf16
    H = qh.shape[0]
    cdt = qh.dtype

    # Scores: standard-form batched matmul, f32 accumulation.
    s = jnp.einsum('hqd,hdk->hqk', qh, kT, preferred_element_type=f32)
    s = s + mask_ref[...][None, :, :]

    # Numerically-stable softmax in f32.
    m = jnp.max(s, axis=-1, keepdims=True)
    e = jnp.exp(s - m)
    denom = jnp.sum(e, axis=-1, keepdims=True)
    recip = 1.0 / denom                  # exact: returned attn rows sum to 1

    # Context from unnormalized e; normalize only the small (H, TQ, Dh) result.
    ctx = jnp.einsum('hqk,hkd->hqd', e.astype(cdt), vh,
                     preferred_element_type=f32) * recip

    # Head-averaged attention weights (PyTorch need_weights=True default).
    attn_ref[0] = jnp.sum(e * recip, axis=0) * (1.0 / H)

    # Output projection: one batched per-head-block matmul + head sum, then
    # residual query + output bias.
    outc = jnp.einsum('hqd,hde->hqe', ctx.astype(cdt), woh_ref[...],
                      preferred_element_type=f32)
    out_ref[0] = qres_ref[0] + bo_ref[...] + jnp.sum(outc, axis=0)


def _mha_flash_kernel(qh_ref, kT_ref, vh_ref, qres_ref, mask_ref,
                      woh_ref, bo_ref, out_ref, m_sc, l_sc, acc_sc):
    """need_weights=False fast path: online softmax over key tiles."""
    f32 = jnp.float32
    ki = pl.program_id(2)

    @pl.when(ki == 0)
    def _():
        m_sc[...] = jnp.full_like(m_sc, -jnp.inf)
        l_sc[...] = jnp.zeros_like(l_sc)
        acc_sc[...] = jnp.zeros_like(acc_sc)

    qh = qh_ref[0]                       # (H, TQ, Dh)
    cdt = qh.dtype

    s = jnp.einsum('hqd,hdk->hqk', qh, kT_ref[0], preferred_element_type=f32)
    s = s + mask_ref[...][None, :, :]

    m_prev = m_sc[...]
    m_new = jnp.maximum(m_prev, jnp.max(s, axis=-1, keepdims=True))
    alpha = jnp.exp(m_prev - m_new)
    e = jnp.exp(s - m_new)
    l_sc[...] = alpha * l_sc[...] + jnp.sum(e, axis=-1, keepdims=True)
    acc_sc[...] = alpha * acc_sc[...] + jnp.einsum(
        'hqk,hkd->hqd', e.astype(cdt), vh_ref[0], preferred_element_type=f32)
    m_sc[...] = m_new

    @pl.when(ki == pl.num_programs(2) - 1)
    def _():
        # Deferred normalization on the (H, TQ, Dh) accumulator (EUP recip).
        ctx = acc_sc[...] * pl.reciprocal(l_sc[...], approx=True)
        outc = jnp.einsum('hqd,hde->hqe', ctx.astype(cdt), woh_ref[...],
                          preferred_element_type=f32)
        out_ref[0] = qres_ref[0] + bo_ref[...] + jnp.sum(outc, axis=0)


def _pick_query_tile(lq, max_tile):
    """Largest query tile <= max_tile that divides Lq and is a multiple of 8."""
    if lq <= max_tile:
        return lq
    t = max_tile
    while t >= 8:
        if lq % t == 0 and t % 8 == 0:
            return t
        t //= 2
    return lq


def _pick_key_tile(lk, max_tile):
    """Largest key tile <= max_tile that divides Lk and is a multiple of 128."""
    if lk <= max_tile:
        return lk
    t = (max_tile // 128) * 128
    while t >= 128:
        if lk % t == 0:
            return t
        t -= 128
    return lk


def _vmem_capacity():
    try:
        return int(pltpu.get_tpu_info().vmem_capacity_bytes)
    except Exception:
        return 64 * 1024 * 1024


def multi_head_attention_w_dropout(query, key, value, query_pos, key_pos,
                                   attn_mask, params, num_heads, *,
                                   need_weights=True, q_tile=128, k_tile=512,
                                   compute_dtype=jnp.bfloat16,
                                   interpret=False):
    """Forward of MultiHeadAttentionwDropout (eval mode, flash_attn=False)."""
    B, Lq, E = query.shape
    Lk = key.shape[1]
    assert E % num_heads == 0, "embed_dims must be divisible by num_heads"
    H = num_heads
    Dh = E // H
    f32 = jnp.float32

    wq, wk, wv, wo, bq, bk, bv, bo = params
    scale = 1.0 / float(Dh) ** 0.5

    # Positional adds + in-projections hoisted to the wrapper (plain XLA GEMMs,
    # computed once per batch element rather than once per query tile).
    qp = query + query_pos if query_pos is not None else query
    kp = key + key_pos if key_pos is not None else key
    if attn_mask is None:
        attn_mask = jnp.zeros((Lq, Lk), f32)
    mask_f = attn_mask.astype(f32)

    q = (jnp.einsum('ble,fe->blf', qp.astype(f32), wq.astype(f32))
         + jnp.asarray(bq, f32).reshape(1, 1, E)) * scale
    k = (jnp.einsum('ble,fe->blf', kp.astype(f32), wk.astype(f32))
         + jnp.asarray(bk, f32).reshape(1, 1, E))
    v = (jnp.einsum('ble,fe->blf', value.astype(f32), wv.astype(f32))
         + jnp.asarray(bv, f32).reshape(1, 1, E))
    # Head split; K pre-transposed to (B, H, Dh, Lk) so the in-kernel scores
    # matmul is standard-form. MXU operands are cast to bf16 once, here.
    qh = q.reshape(B, Lq, H, Dh).transpose(0, 2, 1, 3).astype(compute_dtype)
    kT = k.reshape(B, Lk, H, Dh).transpose(0, 2, 3, 1).astype(compute_dtype)
    vh = v.reshape(B, Lk, H, Dh).transpose(0, 2, 1, 3).astype(compute_dtype)

    woh = wo.T.reshape(H, Dh, E).astype(compute_dtype)       # per-head Wo.T blocks
    bo_f = jnp.asarray(bo, f32).reshape(1, E)
    q_res = query.astype(f32)

    cb = jnp.dtype(compute_dtype).itemsize
    vmem_cap = _vmem_capacity()
    budget = vmem_cap // 2

    if need_weights:
        # The normalized (TQ, Lk) attention map must be materialized anyway, so
        # this path keeps full Lk per step with a generation-aware query tile.
        def est(tq):
            blocks = (tq * E * cb + 2 * E * Lk * cb + tq * E * 4 + tq * Lk * 4
                      + E * E * cb + E * 4 + tq * E * 4 + tq * Lk * 4)
            inter = (2 * H * tq * Lk * 4 + H * tq * Lk * cb + tq * Lk * 4
                     + H * tq * Dh * 4 + H * tq * E * 4)
            return 2 * blocks + inter

        TQ = _pick_query_tile(Lq, q_tile)
        while (TQ > 8 and est(TQ) > budget and Lq % (TQ // 2) == 0
               and (TQ // 2) % 8 == 0):
            TQ //= 2
        nq = Lq // TQ
        vmem_limit = int(min(max(32 << 20, int(1.25 * est(TQ))),
                             int(0.8 * vmem_cap)))

        in_specs = [
            pl.BlockSpec((1, H, TQ, Dh), lambda b, qi: (b, 0, qi, 0)),   # Q heads
            pl.BlockSpec((1, H, Dh, Lk), lambda b, qi: (b, 0, 0, 0)),    # K^T heads
            pl.BlockSpec((1, H, Lk, Dh), lambda b, qi: (b, 0, 0, 0)),    # V heads
            pl.BlockSpec((1, TQ, E), lambda b, qi: (b, qi, 0)),          # residual q
            pl.BlockSpec((TQ, Lk), lambda b, qi: (qi, 0)),               # additive mask
            pl.BlockSpec((H, Dh, E), lambda b, qi: (0, 0, 0)),           # Wo.T blocks
            pl.BlockSpec((1, E), lambda b, qi: (0, 0)),                  # bo
        ]
        out_specs = (pl.BlockSpec((1, TQ, E), lambda b, qi: (b, qi, 0)),
                     pl.BlockSpec((1, TQ, Lk), lambda b, qi: (b, qi, 0)))
        out_shape = (jax.ShapeDtypeStruct((B, Lq, E), f32),
                     jax.ShapeDtypeStruct((B, Lq, Lk), f32))

        out, attn = pl.pallas_call(
            _mha_weights_kernel,
            out_shape=out_shape,
            grid=(B, nq),
            in_specs=in_specs,
            out_specs=out_specs,
            compiler_params=pltpu.CompilerParams(
                dimension_semantics=("parallel", "parallel"),
                vmem_limit_bytes=vmem_limit),
            interpret=interpret,
        )(qh, kT, vh, q_res, mask_f, woh, bo_f)
        return out, attn

    # need_weights=False fast path: key-tiled online softmax, O(H*TQ*TK) VMEM.
    TK = _pick_key_tile(Lk, k_tile)
    nk = Lk // TK

    def est(tq, tk):
        blocks = (tq * E * cb + 2 * E * tk * cb + tq * E * 4 + tq * tk * 4
                  + E * E * cb + E * 4 + tq * E * 4)
        inter = (2 * H * tq * tk * 4 + H * tq * tk * cb
                 + H * tq * Dh * 4 + H * tq * E * 4)
        scratch = H * tq * (2 + Dh) * 4
        return 2 * blocks + inter + scratch

    TQ = _pick_query_tile(Lq, q_tile)
    while (TQ > 8 and est(TQ, TK) > budget and Lq % (TQ // 2) == 0
           and (TQ // 2) % 8 == 0):
        TQ //= 2
    nq = Lq // TQ
    vmem_limit = int(min(max(32 << 20, int(1.25 * est(TQ, TK))),
                         int(0.8 * vmem_cap)))

    in_specs = [
        pl.BlockSpec((1, H, TQ, Dh), lambda b, qi, ki: (b, 0, qi, 0)),
        pl.BlockSpec((1, H, Dh, TK), lambda b, qi, ki: (b, 0, 0, ki)),
        pl.BlockSpec((1, H, TK, Dh), lambda b, qi, ki: (b, 0, ki, 0)),
        pl.BlockSpec((1, TQ, E), lambda b, qi, ki: (b, qi, 0)),
        pl.BlockSpec((TQ, TK), lambda b, qi, ki: (qi, ki)),
        pl.BlockSpec((H, Dh, E), lambda b, qi, ki: (0, 0, 0)),
        pl.BlockSpec((1, E), lambda b, qi, ki: (0, 0)),
    ]
    out = pl.pallas_call(
        _mha_flash_kernel,
        out_shape=jax.ShapeDtypeStruct((B, Lq, E), f32),
        grid=(B, nq, nk),
        in_specs=in_specs,
        out_specs=pl.BlockSpec((1, TQ, E), lambda b, qi, ki: (b, qi, 0)),
        scratch_shapes=[pltpu.VMEM((H, TQ, 1), jnp.float32),
                        pltpu.VMEM((H, TQ, 1), jnp.float32),
                        pltpu.VMEM((H, TQ, Dh), jnp.float32)],
        compiler_params=pltpu.CompilerParams(
            dimension_semantics=("parallel", "parallel", "arbitrary"),
            vmem_limit_bytes=vmem_limit),
        interpret=interpret,
    )(qh, kT, vh, q_res, mask_f, woh, bo_f)
    return out, None


def _reference(query, key, value, query_pos, key_pos, attn_mask, params, num_heads):
    """Pure-JAX f32 reference replicating nn.MultiheadAttention (batch_first, eval)."""
    wq, wk, wv, wo, bq, bk, bv, bo = params
    B, Lq, E = query.shape
    Lk = key.shape[1]
    Dh = E // num_heads
    qp = query + query_pos
    kp = key + key_pos
    q = jnp.einsum('ble,fe->blf', qp, wq) + bq.reshape(1, 1, E)
    k = jnp.einsum('ble,fe->blf', kp, wk) + bk.reshape(1, 1, E)
    v = jnp.einsum('ble,fe->blf', value, wv) + bv.reshape(1, 1, E)
    q = q.reshape(B, Lq, num_heads, Dh).transpose(0, 2, 1, 3)
    k = k.reshape(B, Lk, num_heads, Dh).transpose(0, 2, 1, 3)
    v = v.reshape(B, Lk, num_heads, Dh).transpose(0, 2, 1, 3)
    scores = jnp.einsum('bhqd,bhkd->bhqk', q, k) / (Dh ** 0.5)
    if attn_mask is not None:
        scores = scores + attn_mask[None, None]
    p = jax.nn.softmax(scores, axis=-1)
    ctx = jnp.einsum('bhqk,bhkd->bhqd', p, v).transpose(0, 2, 1, 3).reshape(B, Lq, E)
    out = jnp.einsum('ble,fe->blf', ctx, wo) + bo.reshape(1, 1, E)
    return out + query, p.mean(axis=1)


if __name__ == "__main__":
    B, Lq, Lk, E, H = 2, 8, 8, 32, 4
    key0 = jax.random.PRNGKey(0)
    ks = jax.random.split(key0, 16)

    query = jax.random.normal(ks[0], (B, Lq, E), jnp.float32)
    key_t = jax.random.normal(ks[1], (B, Lk, E), jnp.float32)
    value = jax.random.normal(ks[2], (B, Lk, E), jnp.float32)
    query_pos = jax.random.normal(ks[3], (B, Lq, E), jnp.float32)
    key_pos = jax.random.normal(ks[4], (B, Lk, E), jnp.float32)
    attn_mask = 0.1 * jax.random.normal(ks[5], (Lq, Lk), jnp.float32)

    # Deterministic parameter init (same shapes as nn.MultiheadAttention's
    # in_proj_weight split into Wq/Wk/Wv, plus out_proj).
    wscale = 0.05
    wq = wscale * jax.random.normal(ks[6], (E, E), jnp.float32)
    wk = wscale * jax.random.normal(ks[7], (E, E), jnp.float32)
    wv = wscale * jax.random.normal(ks[8], (E, E), jnp.float32)
    wo = wscale * jax.random.normal(ks[9], (E, E), jnp.float32)
    bq = wscale * jax.random.normal(ks[10], (1, E), jnp.float32)
    bk = wscale * jax.random.normal(ks[11], (1, E), jnp.float32)
    bv = wscale * jax.random.normal(ks[12], (1, E), jnp.float32)
    bo = wscale * jax.random.normal(ks[13], (1, E), jnp.float32)
    params = (wq, wk, wv, wo, bq, bk, bv, bo)

    # Default path (matches the module: attention weights are returned).
    out, attn = multi_head_attention_w_dropout(
        query, key_t, value, query_pos, key_pos, attn_mask, params, H)
    jax.block_until_ready((out, attn))

    out_ref, attn_ref = _reference(
        query, key_t, value, query_pos, key_pos, attn_mask, params, H)
    # bf16 MXU operands with f32 accumulation -> mixed-precision tolerance.
    assert jnp.allclose(out, out_ref, atol=3e-2, rtol=3e-2), "output mismatch"
    assert jnp.allclose(attn, attn_ref, atol=2e-2, rtol=5e-2), "attn mismatch"

    # need_weights=False fast path: key-tiled online softmax, no attention map.
    out_nw, attn_none = multi_head_attention_w_dropout(
        query, key_t, value, query_pos, key_pos, attn_mask, params, H,
        need_weights=False)
    jax.block_until_ready(out_nw)
    assert attn_none is None
    assert jnp.allclose(out_nw, out_ref, atol=3e-2, rtol=3e-2), "nw output mismatch"

    print("KERNEL_OK")
</pallas_src>

<mosaic_0001>
module attributes {stable_mosaic.version = 11 : i64} {
  func.func @_mha_weights_kernel(%arg0: i32, %arg1: i32, %arg2: memref<1x4x8x8xbf16, #tpu.memory_space<vmem>>, %arg3: memref<1x4x8x8xbf16, #tpu.memory_space<vmem>>, %arg4: memref<1x4x8x8xbf16, #tpu.memory_space<vmem>>, %arg5: memref<1x8x32xf32, #tpu.memory_space<vmem>>, %arg6: memref<8x8xf32, #tpu.memory_space<vmem>>, %arg7: memref<4x8x32xbf16, #tpu.memory_space<vmem>>, %arg8: memref<1x32xf32, #tpu.memory_space<vmem>>, %arg9: memref<1x8x32xf32, #tpu.memory_space<vmem>>, %arg10: memref<1x8x8xf32, #tpu.memory_space<vmem>>) attributes {dimension_semantics = [#tpu.dimension_semantics<parallel>, #tpu.dimension_semantics<parallel>], iteration_bounds = array<i64: 2, 1>, scalar_prefetch = 0 : i64, scratch_operands = 0 : i64, tpu.core_type = #tpu.core_type<tc>, window_params = [{transform_indices = @transform_0, window_bounds = array<i64: 1, 4, 8, 8>}, {transform_indices = @transform_1, window_bounds = array<i64: 1, 4, 8, 8>}, {transform_indices = @transform_2, window_bounds = array<i64: 1, 4, 8, 8>}, {transform_indices = @transform_3, window_bounds = array<i64: 1, 8, 32>}, {transform_indices = @transform_4, window_bounds = array<i64: 8, 8>}, {pipeline_mode = #tpu.pipeline_mode<synchronous>, transform_indices = @transform_5, window_bounds = array<i64: 4, 8, 32>}, {pipeline_mode = #tpu.pipeline_mode<synchronous>, transform_indices = @transform_6, window_bounds = array<i64: 1, 32>}, {transform_indices = @transform_7, window_bounds = array<i64: 1, 8, 32>}, {transform_indices = @transform_8, window_bounds = array<i64: 1, 8, 8>}]} {
    %c0 = arith.constant 0 : index
    %c0_0 = arith.constant 0 : index
    %c0_1 = arith.constant 0 : index
    %c0_2 = arith.constant 0 : index
    %0 = vector.load %arg2[%c0, %c0_0, %c0_1, %c0_2] : memref<1x4x8x8xbf16, #tpu.memory_space<vmem>>, vector<1x4x8x8xbf16>
    %1 = vector.shape_cast %0 : vector<1x4x8x8xbf16> to vector<4x8x8xbf16>
    %c0_3 = arith.constant 0 : index
    %c0_4 = arith.constant 0 : index
    %c0_5 = arith.constant 0 : index
    %c0_6 = arith.constant 0 : index
    %2 = vector.load %arg3[%c0_3, %c0_4, %c0_5, %c0_6] : memref<1x4x8x8xbf16, #tpu.memory_space<vmem>>, vector<1x4x8x8xbf16>
    %3 = vector.shape_cast %2 : vector<1x4x8x8xbf16> to vector<4x8x8xbf16>
    %c0_7 = arith.constant 0 : index
    %c0_8 = arith.constant 0 : index
    %c0_9 = arith.constant 0 : index
    %c0_10 = arith.constant 0 : index
    %4 = vector.load %arg4[%c0_7, %c0_8, %c0_9, %c0_10] : memref<1x4x8x8xbf16, #tpu.memory_space<vmem>>, vector<1x4x8x8xbf16>
    %5 = vector.shape_cast %4 : vector<1x4x8x8xbf16> to vector<4x8x8xbf16>
    "tpu.trace_start"() <{level = 10 : i32, message = "hqd,hdk->hqk"}> : () -> ()
    %cst = arith.constant dense<0.000000e+00> : vector<4x8x8xf32>
    %6 = tpu.matmul %1, %3, %cst {dimension_numbers = #tpu.dot_dimension_numbers<[2], [1], [1], [2], [0, 0, 0, 1, 1, 2], [0], [0]>} : vector<4x8x8xbf16>, vector<4x8x8xbf16>, vector<4x8x8xf32> -> vector<4x8x8xf32>
    "tpu.trace_stop"() : () -> ()
    %c0_11 = arith.constant 0 : index
    %c0_12 = arith.constant 0 : index
    %7 = vector.load %arg6[%c0_11, %c0_12] : memref<8x8xf32, #tpu.memory_space<vmem>>, vector<8x8xf32>
    %8 = vector.shape_cast %7 : vector<8x8xf32> to vector<1x8x8xf32>
    %9 = vector.broadcast %8 : vector<1x8x8xf32> to vector<4x8x8xf32>
    %10 = arith.addf %6, %9 : vector<4x8x8xf32>
    %cst_13 = arith.constant dense<0xFF800000> : vector<4x8xf32>
    %11 = vector.multi_reduction <maximumf>, %10, %cst_13 [2] : vector<4x8x8xf32> to vector<4x8xf32>
    %12 = vector.shape_cast %11 : vector<4x8xf32> to vector<4x8x1xf32>
    %13 = vector.broadcast %12 : vector<4x8x1xf32> to vector<4x8x8xf32>
    %14 = arith.subf %10, %13 : vector<4x8x8xf32>
    %15 = math.exp %14 : vector<4x8x8xf32>
    %cst_14 = arith.constant dense<0.000000e+00> : vector<4x8xf32>
    %16 = vector.multi_reduction <add>, %15, %cst_14 [2] : vector<4x8x8xf32> to vector<4x8xf32>
    %17 = vector.shape_cast %16 : vector<4x8xf32> to vector<4x8x1xf32>
    %cst_15 = arith.constant 1.000000e+00 : f32
    %18 = vector.broadcast %cst_15 : f32 to vector<4x8x1xf32>
    %19 = arith.divf %18, %17 : vector<4x8x1xf32>
    %20 = arith.truncf %15 : vector<4x8x8xf32> to vector<4x8x8xbf16>
    "tpu.trace_start"() <{level = 10 : i32, message = "hqk,hkd->hqd"}> : () -> ()
    %cst_16 = arith.constant dense<0.000000e+00> : vector<4x8x8xf32>
    %21 = tpu.matmul %20, %5, %cst_16 {dimension_numbers = #tpu.dot_dimension_numbers<[2], [1], [1], [2], [0, 0, 0, 1, 1, 2], [0], [0]>} : vector<4x8x8xbf16>, vector<4x8x8xbf16>, vector<4x8x8xf32> -> vector<4x8x8xf32>
    "tpu.trace_stop"() : () -> ()
    %22 = vector.broadcast %19 : vector<4x8x1xf32> to vector<4x8x8xf32>
    %23 = arith.mulf %21, %22 : vector<4x8x8xf32>
    %24 = vector.broadcast %19 : vector<4x8x1xf32> to vector<4x8x8xf32>
    %25 = arith.mulf %15, %24 : vector<4x8x8xf32>
    %cst_17 = arith.constant dense<0.000000e+00> : vector<8x8xf32>
    %26 = vector.multi_reduction <add>, %25, %cst_17 [0] : vector<4x8x8xf32> to vector<8x8xf32>
    %cst_18 = arith.constant 2.500000e-01 : f32
    %27 = vector.broadcast %cst_18 : f32 to vector<8x8xf32>
    %28 = arith.mulf %26, %27 : vector<8x8xf32>
    %c0_19 = arith.constant 0 : index
    %c0_20 = arith.constant 0 : index
    %c0_21 = arith.constant 0 : index
    %29 = vector.load %arg10[%c0_19, %c0_20, %c0_21] : memref<1x8x8xf32, #tpu.memory_space<vmem>>, vector<1x8x8xf32>
    %30 = vector.shape_cast %29 : vector<1x8x8xf32> to vector<8x8xf32>
    %31 = vector.shape_cast %28 : vector<8x8xf32> to vector<1x8x8xf32>
    tpu.vector_store %arg10[%c0_19, %c0_20, %c0_21], %31 {strides = array<i32>} : memref<1x8x8xf32, #tpu.memory_space<vmem>>, vector<1x8x8xf32>,
    %32 = arith.truncf %23 : vector<4x8x8xf32> to vector<4x8x8xbf16>
    %c0_22 = arith.constant 0 : index
    %c0_23 = arith.constant 0 : index
    %c0_24 = arith.constant 0 : index
    %33 = vector.load %arg7[%c0_22, %c0_23, %c0_24] : memref<4x8x32xbf16, #tpu.memory_space<vmem>>, vector<4x8x32xbf16>
    "tpu.trace_start"() <{level = 10 : i32, message = "hqd,hde->hqe"}> : () -> ()
    %cst_25 = arith.constant dense<0.000000e+00> : vector<4x8x32xf32>
    %34 = tpu.matmul %32, %33, %cst_25 {dimension_numbers = #tpu.dot_dimension_numbers<[2], [1], [1], [2], [0, 0, 0, 1, 1, 2], [0], [0]>} : vector<4x8x8xbf16>, vector<4x8x32xbf16>, vector<4x8x32xf32> -> vector<4x8x32xf32>
    "tpu.trace_stop"() : () -> ()
    %c0_26 = arith.constant 0 : index
    %c0_27 = arith.constant 0 : index
    %c0_28 = arith.constant 0 : index
    %35 = vector.load %arg5[%c0_26, %c0_27, %c0_28] : memref<1x8x32xf32, #tpu.memory_space<vmem>>, vector<1x8x32xf32>
    %36 = vector.shape_cast %35 : vector<1x8x32xf32> to vector<8x32xf32>
    %c0_29 = arith.constant 0 : index
    %c0_30 = arith.constant 0 : index
    %37 = vector.load %arg8[%c0_29, %c0_30] : memref<1x32xf32, #tpu.memory_space<vmem>>, vector<1x32xf32>
    %38 = vector.broadcast %37 : vector<1x32xf32> to vector<8x32xf32>
    %39 = arith.addf %36, %38 : vector<8x32xf32>
    %cst_31 = arith.constant dense<0.000000e+00> : vector<8x32xf32>
    %40 = vector.multi_reduction <add>, %34, %cst_31 [0] : vector<4x8x32xf32> to vector<8x32xf32>
    %41 = arith.addf %39, %40 : vector<8x32xf32>
    %c0_32 = arith.constant 0 : index
    %c0_33 = arith.constant 0 : index
    %c0_34 = arith.constant 0 : index
    %42 = vector.load %arg9[%c0_32, %c0_33, %c0_34] : memref<1x8x32xf32, #tpu.memory_space<vmem>>, vector<1x8x32xf32>
    %43 = vector.shape_cast %42 : vector<1x8x32xf32> to vector<8x32xf32>
    %44 = vector.shape_cast %41 : vector<8x32xf32> to vector<1x8x32xf32>
    tpu.vector_store %arg9[%c0_32, %c0_33, %c0_34], %44 {strides = array<i32>} : memref<1x8x32xf32, #tpu.memory_space<vmem>>, vector<1x8x32xf32>,
    return
  }
  func.func @transform_0(%arg0: i32, %arg1: i32) -> (i32, i32, i32, i32) {
    %c0_i32 = arith.constant 0 : i32
    %c0_i32_0 = arith.constant 0 : i32
    %c0_i32_1 = arith.constant 0 : i32
    return %arg0, %c0_i32, %arg1, %c0_i32_0 : i32, i32, i32, i32
  }
  func.func @transform_1(%arg0: i32, %arg1: i32) -> (i32, i32, i32, i32) {
    %c0_i32 = arith.constant 0 : i32
    %c0_i32_0 = arith.constant 0 : i32
    %c0_i32_1 = arith.constant 0 : i32
    %c0_i32_2 = arith.constant 0 : i32
    return %arg0, %c0_i32, %c0_i32_0, %c0_i32_1 : i32, i32, i32, i32
  }
  func.func @transform_2(%arg0: i32, %arg1: i32) -> (i32, i32, i32, i32) {
    %c0_i32 = arith.constant 0 : i32
    %c0_i32_0 = arith.constant 0 : i32
    %c0_i32_1 = arith.constant 0 : i32
    %c0_i32_2 = arith.constant 0 : i32
    return %arg0, %c0_i32, %c0_i32_0, %c0_i32_1 : i32, i32, i32, i32
  }
  func.func @transform_3(%arg0: i32, %arg1: i32) -> (i32, i32, i32) {
    %c0_i32 = arith.constant 0 : i32
    %c0_i32_0 = arith.constant 0 : i32
    return %arg0, %arg1, %c0_i32 : i32, i32, i32
  }
  func.func @transform_4(%arg0: i32, %arg1: i32) -> (i32, i32) {
    %c0_i32 = arith.constant 0 : i32
    %c0_i32_0 = arith.constant 0 : i32
    return %arg1, %c0_i32 : i32, i32
  }
  func.func @transform_5(%arg0: i32, %arg1: i32) -> (i32, i32, i32) {
    %c0_i32 = arith.constant 0 : i32
    %c0_i32_0 = arith.constant 0 : i32
    %c0_i32_1 = arith.constant 0 : i32
    %c0_i32_2 = arith.constant 0 : i32
    return %c0_i32, %c0_i32_0, %c0_i32_1 : i32, i32, i32
  }
  func.func @transform_6(%arg0: i32, %arg1: i32) -> (i32, i32) {
    %c0_i32 = arith.constant 0 : i32
    %c0_i32_0 = arith.constant 0 : i32
    %c0_i32_1 = arith.constant 0 : i32
    return %c0_i32, %c0_i32_0 : i32, i32
  }
  func.func @transform_7(%arg0: i32, %arg1: i32) -> (i32, i32, i32) {
    %c0_i32 = arith.constant 0 : i32
    %c0_i32_0 = arith.constant 0 : i32
    return %arg0, %arg1, %c0_i32 : i32, i32, i32
  }
  func.func @transform_8(%arg0: i32, %arg1: i32) -> (i32, i32, i32) {
    %c0_i32 = arith.constant 0 : i32
    %c0_i32_0 = arith.constant 0 : i32
    return %arg0, %arg1, %c0_i32 : i32, i32, i32
  }
}

</mosaic_0001>

<bundles_post_ra>
// kernel: tpu_custom_call.1
= control target key start
LH: loop header
LB: loop body
LE: loop exit
PB: predicated region body
PF: predicated region fallthrough
CT: control target
= control target key end

     0   :  { %s2448_s0 = inlined_call_operand.hbm [shape: bf16[2,4,8,8], index: 0, kind: input, shape index: {}]   ;;  %s2449_s1 = inlined_call_operand.hbm [shape: bf16[2,4,8,8], index: 1, kind: input, shape index: {}]   ;;  %s2450_s2 = inlined_call_operand.hbm [shape: bf16[2,4,8,8], index: 2, kind: input, shape index: {}]   ;;  %s2451_s3 = inlined_call_operand.hbm [shape: f32[2,8,32], index: 3, kind: input, shape index: {}]   ;;  %s2452_s4 = inlined_call_operand.hbm [shape: f32[8,8], index: 4, kind: input, shape index: {}]   ;;  %s2453_s5 = inlined_call_operand.vmem [shape: bf16[4,8,32], index: 5, kind: input, shape index: {}]   ;;  %s2454_s6 = inlined_call_operand.vmem [shape: f32[1,32], index: 6, kind: input, shape index: {}]   ;;  %s2455_s7 = inlined_call_operand.hbm [shape: f32[2,8,32], index: 7, kind: output, shape index: {0}]   ;;  %s2456_s8 = inlined_call_operand.hbm [shape: f32[2,8,8], index: 8, kind: output, shape index: {1}]  }
   0x1   :  { %2471 = sst [smem:[#allocation25_spill]] %s2448_s0 }
   0x2   :  { %2472 = sst [smem:[#allocation26_spill]] %s2449_s1 }
   0x3   :  { %2473 = sst [smem:[#allocation27_spill]] %s2452_s4 }
   0x4   :  { %2474 = sst [smem:[#allocation28_spill]] %s2455_s7 }
   0x5   :  { %14 = vsyncpa [#allocation3], 0 }
   0x6   :  { %16 = vsyncpa [#allocation3 + $0x1], 0 }
   0x7   :  { %17 = vsyncpa [#allocation6], 0 }
   0x8   :  { %19 = vsyncpa [#allocation6 + $0x1], 0 }
   0x9   :  { %20 = vsyncpa [#allocation9], 0 }
   0xa   :  { %22 = vsyncpa [#allocation9 + $0x1], 0 }
   0xb   :  { %23 = vsyncpa [#allocation4], 0 }
   0xc   :  { %25 = vsyncpa [#allocation4 + $0x1], 0 }
   0xd   :  { %26 = vsyncpa [#allocation13], 0 }
   0xe   :  { %28 = vsyncpa [#allocation13 + $0x1], 0  ;;  %s1963_s27 = smov 0   ;;  %s1965_s28 = smov 0  }
   0xf   :  { %s1967_s29 = smov 0   ;;  %s1969_s30 = smov 0  }
  0x10   :  { %s1971_s9 = smov 0   ;;  %s1973_s10 = smov 0  }
  0x11 LB: > { %2475 = sst [smem:[#allocation20_spill]] %s1885_s27  ;;  %s1994_s11 = sadd.s32 4294967295, %s1905_s10   ;;  %s1905_s10 = sphi %s1973_s10, %s34_s10   ;;  %s1901_s9 = sphi %s1971_s9, %s2514_s9   ;;  %s1897_s30 = sphi %s1969_s30, %s2513_s30   ;;  %s1893_s29 = sphi %s1967_s29, %s2509_s29   ;;  %s1889_s28 = sphi %s1965_s28, %s2512_s28   ;;  %s1885_s27 = sphi %s1963_s27, %s2511_s27  }
  0x12   : > { %2476 = sst [smem:[#allocation21_spill]] %s1893_s29  ;;  %s1377_s12 = sadd.s32 4294967294, %s1905_s10  }
  0x13   : > { %p62_p0 = scmp.ne.s32.totalorder %s1893_s29, %s1889_s28  ;;  %p63_p1 = scmp.eq.s32.totalorder %s1905_s10, 0 }
  0x14   : > { %p68_p2 = scmp.ne.s32.totalorder %s1889_s28, %s1885_s27  ;;  %p2460_p3 = scmp.eq.s32.totalorder %s1994_s11, 0 }
  0x15   : > { %p242_p4 = scmp.eq.s32.totalorder %s1994_s11, 1  ;;  %p2005_p5 = por %p63_p1, %p62_p0 }
  0x16   : > { %p248_p6 = scmp.eq.s32.totalorder %s1377_s12, 1  ;;  %p2011_p7 = por %p2460_p3, %p68_p2 }
  0x17   : > { %p2015_p8 = por %p242_p4, %p62_p0  ;;  %p1378_p10 = scmp.ge.s32.totalorder %s1905_s10, 1 }
  0x18   : > { %s2478_s15 = scalar_select %p2011_p7, 1, 0 }
  0x19   : > { %s2479_s16 = scalar_select %p2015_p8, 1, 0 }
  0x1a   : > { %p2019_p9 = por %p248_p6, %p68_p2  ;;  %p283_p11 = scmp.lt.s32.totalorder %s1905_s10, 3 }
  0x1b   : > { %s1907_s19 = smov [#allocation10]   ;;  %p1559_p1 = scmp.lt.s32.totalorder %s1905_s10, 2 }
  0x1c   : > { %s2480_s17 = scalar_select %p2019_p9, 1, 0 }
  0x1d   : > { %p2026_p13 = pnand %p1378_p10, %p283_p11  ;;  %s298_s20 = sshll.u32 %s1907_s19, 4  ;;  %s299_s20 = int_to_ptr.vmem [resolvable:$true] %s298_s20 }
  0x1e   : > { %2481 = sst [smem:[#allocation22_spill]] %s2480_s17  ;;  %p2035_p4 = pnand %p1559_p1, %p2005_p5 }
  0x1f   : > { %s2482_s18 = scalar_select %p2026_p13, 1, 0 }
  0x20   : > { %p1534_p0 = pneg %p2026_p13  ;;  %s46_s23 = sadd.s32 1, %s1901_s9 }
  0x21   : > { %s2483_s21 = scalar_select %p2035_p4, 1, 0 }
  0x22   : > { %p2041_p2 = pnand %p1534_p0, %p2460_p3  ;;  %p2046_p6 = scmp.ge.s32.totalorder %s46_s23, 2 }
  0x23   : > { %s2051_s25 = sand.u32 1, %s1893_s29   ;;  %s2486_s4 = sld [smem:[#allocation27_spill]] }
  0x24   : > { %s2485_s24 = scalar_select %p2046_p6, 1, 0 }
  0x25   : > { %p1633_p10 = pneg %p2041_p2 }
  0x29   : > { %s1631_s14 = scalar_lea.hbm %s2486_s4, 128 }
  0x2a   : > { %p1632_p5 = scmp.ne.s32.totalorder %s2486_s4, %s1631_s14  ;;  %p1638_p0 = scmp.lt.u32.totalorder %s1631_s14, %s2486_s4 }
  0x2c   : > { %p1634_p11 = pnand %p1633_p10, %p1632_p5 }
  0x2e   : > { %p1635_p1 = pneg %p1634_p11 }
  0x30   : > { %p1640_p12 = pnand %p1638_p0, %p1635_p1 }
  0x32   : > { %1643 = shalt.err (!%p1640_p12)
}
  0x33   : > { %s1644_s7 = scalar_lea.vmem %s299_s20, 128  ;;  %p1652_p7 = scmp.lt.s32.totalorder %s299_s20, %s299_s20 }
  0x34   : > { %p1645_p3 = scmp.ne.s32.totalorder %s299_s20, %s1644_s7  ;;  %p1653_p13 = scmp.lt.s32.totalorder %s1644_s7, %s1644_s7 }
  0x36   : > { %p1647_p9 = pnand %p1645_p3, %p1633_p10  ;;  %p1654_p4 = por %p1653_p13, %p1652_p7 }
  0x38   : > { %p1648_p8 = pneg %p1647_p9 }
  0x3a   : > { %p1655_p6 = pnand %p1654_p4, %p1648_p8 }
  0x3c   : > { %1658 = shalt.err (!%p1655_p6)
}
  0x3d   : > { %1537 = dma.hbm_to_vmem [thread:$0]  (!%p2041_p2), %s2486_s4, 128, %s299_s20, [#allocation9]  }
  0x3e   : > { %p2487_p3 = scmp.ne.s32.totalorder %s2485_s24, 0  ;;  %s2074_s7 = sshll.u32 %s2051_s25, 4 }
  0x3f   : > { %s2077_s27 = sshll.u32 %s1901_s9, 8  ;;  %s2466_s22 = sand.u32 1, %s1905_s10  }
  0x40   : > { %s2516_s23 = smov (%p2487_p3, %s46_s23), 0  ;;  %s2489_s12 = sadd.s32 1, %s1893_s29 }
  0x41   : > { %2488 = sst [smem:[#allocation23_spill]] %s2516_s23  ;;  %s50_s17 = ssub.s32 %s1901_s9, %s2516_s23 }
  0x42   : > { %p53_p7 = scmp.eq.s32.totalorder %s50_s17, 0  ;;  %s2491_s1 = sld [smem:[#allocation26_spill]] }
  0x43   : > { %s341_s24 = scalar_lea.vmem [#allocation5], %s2074_s7  ;;  %s2098_s4 = scalar_lea.sflag [#allocation6], %s2466_s22 }
  0x44   : > { %s2085_s14 = scalar_select %p53_p7, %s1893_s29, %s2489_s12  }
  0x45   : > { %s348_s26 = sshll.u32 %s341_s24, 4  ;;  %p2492_p9 = scmp.ne.s32.totalorder %s2483_s21, 0  ;;  %s2094_s26 = int_to_ptr.vmem [resolvable:$true] %s348_s26 }
  0x46   : > { %2490 = sst [smem:[#allocation24_spill]] %s2085_s14 }
  0x47   : > { %p2104_p12 = pneg %p2492_p9 }
  0x48   : > { %s2091_s20 = scalar_lea.hbm %s2491_s1, %s2077_s27  ;;  %s1664_s24 = scalar_lea.hbm %s2491_s1, 512 }
  0x49   : > { %s1659_s17 = scalar_lea.hbm %s2091_s20, 256  ;;  %p1665_p2 = scmp.lt.u32.totalorder %s2091_s20, %s2491_s1 }
  0x4a   : > { %p1660_p8 = scmp.ne.s32.totalorder %s2091_s20, %s1659_s17  ;;  %p1666_p6 = scmp.lt.u32.totalorder %s1664_s24, %s1659_s17 }
  0x4b   : > { %p1668_p10 = scmp.lt.u32.totalorder %s1659_s17, %s2091_s20 }
  0x4c   : > { %p1662_p13 = pnand %p2104_p12, %p1660_p8  ;;  %p1667_p5 = por %p1666_p6, %p1665_p2 }
  0x4e   : > { %p1663_p4 = pneg %p1662_p13  ;;  %p1669_p11 = por %p1668_p10, %p1667_p5 }
  0x50   : > { %p1670_p1 = pnand %p1669_p11, %p1663_p4 }
  0x52   : > { %1673 = shalt.err (!%p1670_p1)
}
  0x53   : > { %s1674_s22 = scalar_lea.vmem %s2094_s26, 256  ;;  %s1908_s19 = smov [#allocation5]  }
  0x54   : > { %p1675_p0 = scmp.ne.s32.totalorder %s2094_s26, %s1674_s22  ;;  %s1679_s13 = sshll.u32 %s1908_s19, 4  ;;  %s1680_s13 = int_to_ptr.vmem [resolvable:$false] %s1679_s13 }
  0x55   : > { %s1681_s23 = scalar_lea.vmem %s1680_s13, 512  ;;  %p1682_p8 = scmp.lt.s32.totalorder %s2094_s26, %s1680_s13 }
  0x56   : > { %p1677_p3 = pnand %p1675_p0, %p2104_p12  ;;  %p1683_p13 = scmp.lt.s32.totalorder %s1681_s23, %s1674_s22 }
  0x58   : > { %p1678_p7 = pneg %p1677_p3  ;;  %p1684_p2 = por %p1683_p13, %p1682_p8 }
  0x5a   : > { %p1685_p6 = pnand %p1684_p2, %p1678_p7 }
  0x5c   : > { %1688 = shalt.err (!%p1685_p6)
}
  0x5d   : > { %s2468_s14 = smov 64   ;;  %s1910_s17 = smov 4  }
  0x5e   : > { %1544 = dma.hbm_to_vmem [thread:$0]  (!%p2492_p9), %s2091_s20, 256, %s2094_s26, %s2098_s4, %s2468_s14, %s2468_s14, %s1910_s17  }
  0x5f   : > { %s2494_s0 = sld [smem:[#allocation25_spill]]  ;;  %s319_s13 = scalar_lea.vmem [#allocation2], %s2074_s7 }
  0x60   : > { %s327_s23 = sshll.u32 %s319_s13, 4  ;;  %s316_s1 = scalar_lea.sflag [#allocation3], %s2051_s25  ;;  %s2138_s23 = int_to_ptr.vmem [resolvable:$true] %s327_s23 }
  0x65   : > { %s2135_s19 = scalar_lea.hbm %s2494_s0, %s2077_s27  ;;  %s1694_s24 = scalar_lea.hbm %s2494_s0, 512 }
  0x66   : > { %s1689_s29 = scalar_lea.hbm %s2135_s19, 256  ;;  %p1695_p11 = scmp.lt.u32.totalorder %s2135_s19, %s2494_s0 }
  0x67   : > { %p1690_p4 = scmp.ne.s32.totalorder %s2135_s19, %s1689_s29  ;;  %p1696_p1 = scmp.lt.u32.totalorder %s1694_s24, %s1689_s29 }
  0x68   : > { %p1698_p3 = scmp.lt.u32.totalorder %s1689_s29, %s2135_s19 }
  0x69   : > { %p1692_p5 = pnand %p1690_p4, %p2104_p12  ;;  %p1697_p0 = por %p1696_p1, %p1695_p11 }
  0x6b   : > { %p1693_p10 = pneg %p1692_p5  ;;  %p1699_p7 = por %p1698_p3, %p1697_p0 }
  0x6d   : > { %p1700_p8 = pnand %p1699_p7, %p1693_p10 }
  0x6f   : > { %1703 = shalt.err (!%p1700_p8)
}
  0x70   : > { %s1704_s13 = scalar_lea.vmem %s2138_s23, 256  ;;  %s1911_s20 = smov [#allocation2]  }
  0x71   : > { %p1705_p13 = scmp.ne.s32.totalorder %s2138_s23, %s1704_s13  ;;  %s1709_s26 = sshll.u32 %s1911_s20, 4  ;;  %s1710_s26 = int_to_ptr.vmem [resolvable:$false] %s1709_s26 }
  0x72   : > { %s1711_s14 = scalar_lea.vmem %s1710_s26, 512  ;;  %p1712_p4 = scmp.lt.s32.totalorder %s2138_s23, %s1710_s26 }
  0x73   : > { %p1707_p2 = pnand %p1705_p13, %p2104_p12  ;;  %p1713_p5 = scmp.lt.s32.totalorder %s1711_s14, %s1704_s13 }
  0x75   : > { %p1708_p6 = pneg %p1707_p2  ;;  %p1714_p11 = por %p1713_p5, %p1712_p4 }
  0x77   : > { %p1715_p1 = pnand %p1714_p11, %p1708_p6 }
  0x79   : > { %1718 = shalt.err (!%p1715_p1)
}
  0x7a   : > { %s2495_s29 = smov 64   ;;  %s2171_s13 = scalar_lea.hbm %s2450_s2, %s2077_s27 }
  0x7b   : > { %1541 = dma.hbm_to_vmem [thread:$0]  (!%p2492_p9), %s2135_s19, 256, %s2138_s23, %s316_s1, %s2495_s29, %s2495_s29, %s1910_s17  }
  0x7c   : > { %s362_s20 = scalar_lea.vmem [#allocation7], %s2074_s7  ;;  %s1719_s14 = scalar_lea.hbm %s2171_s13, 256 }
  0x7d   : > { %s369_s26 = sshll.u32 %s362_s20, 4  ;;  %p1720_p10 = scmp.ne.s32.totalorder %s2171_s13, %s1719_s14  ;;  %s2174_s26 = int_to_ptr.vmem [resolvable:$true] %s369_s26 }
  0x7e   : > { %s1724_s19 = scalar_lea.hbm %s2450_s2, 512  ;;  %p1725_p7 = scmp.lt.u32.totalorder %s2171_s13, %s2450_s2 }
  0x7f   : > { %p1722_p0 = pnand %p1720_p10, %p2104_p12  ;;  %p1726_p8 = scmp.lt.u32.totalorder %s1724_s19, %s1719_s14 }
  0x80   : > { %p1728_p2 = scmp.lt.u32.totalorder %s1719_s14, %s2171_s13 }
  0x81   : > { %p1723_p3 = pneg %p1722_p0  ;;  %p1727_p13 = por %p1726_p8, %p1725_p7 }
  0x83   : > { %p1729_p6 = por %p1728_p2, %p1727_p13 }
  0x85   : > { %p1730_p4 = pnand %p1729_p6, %p1723_p3 }
  0x87   : > { %1733 = shalt.err (!%p1730_p4)
}
  0x88   : > { %s1734_s7 = scalar_lea.vmem %s2174_s26, 256  ;;  %s1912_s0 = smov [#allocation7]  }
  0x89   : > { %p1735_p5 = scmp.ne.s32.totalorder %s2174_s26, %s1734_s7  ;;  %s1739_s24 = sshll.u32 %s1912_s0, 4  ;;  %s1740_s24 = int_to_ptr.vmem [resolvable:$false] %s1739_s24 }
  0x8a   : > { %s1741_s22 = scalar_lea.vmem %s1740_s24, 512  ;;  %p1742_p10 = scmp.lt.s32.totalorder %s2174_s26, %s1740_s24 }
  0x8b   : > { %p1737_p11 = pnand %p1735_p5, %p2104_p12  ;;  %p1743_p0 = scmp.lt.s32.totalorder %s1741_s22, %s1734_s7 }
  0x8d   : > { %p1738_p1 = pneg %p1737_p11  ;;  %p1744_p7 = por %p1743_p0, %p1742_p10 }
  0x8f   : > { %p1745_p8 = pnand %p1744_p7, %p1738_p1 }
  0x91   : > { %1748 = shalt.err (!%p1745_p8)
}
  0x92   : > { %1547 = dma.hbm_to_vmem [thread:$0]  (!%p2492_p9), %s2171_s13, 256, %s2174_s26, %s2098_s4, %s2495_s29, %s2495_s29, %s1910_s17  }
  0x93   : > { %s1390_s20 = sshll.u32 %s2051_s25, 3  ;;  %s1391_s14 = sshll.u32 %s1901_s9, 7 }
  0x94   : > { %s2206_s23 = scalar_lea.hbm %s2451_s3, %s1391_s14  ;;  %s383_s27 = scalar_lea.vmem [#allocation8], %s1390_s20 }
  0x95   : > { %s391_s7 = sshll.u32 %s383_s27, 4  ;;  %s2496_s0 = sand.u32 1, %s1905_s10   ;;  %s392_s7 = int_to_ptr.vmem [resolvable:$true] %s391_s7 }
  0x96   : > { %s380_s24 = scalar_lea.sflag [#allocation9], %s2496_s0  ;;  %s1749_s22 = scalar_lea.hbm %s2206_s23, 128 }
  0x97   : > { %p1750_p3 = scmp.ne.s32.totalorder %s2206_s23, %s1749_s22  ;;  %s1754_s17 = scalar_lea.hbm %s2451_s3, 256 }
  0x98   : > { %p1755_p6 = scmp.lt.u32.totalorder %s2206_s23, %s2451_s3  ;;  %p1756_p4 = scmp.lt.u32.totalorder %s1754_s17, %s1749_s22 }
  0x99   : > { %p1752_p13 = pnand %p1750_p3, %p2104_p12  ;;  %p1758_p11 = scmp.lt.u32.totalorder %s1749_s22, %s2206_s23 }
  0x9a   : > { %p1757_p5 = por %p1756_p4, %p1755_p6 }
  0x9b   : > { %p1753_p2 = pneg %p1752_p13 }
  0x9c   : > { %p1759_p1 = por %p1758_p11, %p1757_p5 }
  0x9e   : > { %p1760_p10 = pnand %p1759_p1, %p1753_p2 }
  0xa0   : > { %1763 = shalt.err (!%p1760_p10)
}
  0xa1   : > { %s1764_s26 = scalar_lea.vmem %s392_s7, 128  ;;  %s1913_s20 = smov [#allocation8]  }
  0xa2   : > { %p1765_p0 = scmp.ne.s32.totalorder %s392_s7, %s1764_s26  ;;  %s1769_s14 = sshll.u32 %s1913_s20, 4  ;;  %s1770_s14 = int_to_ptr.vmem [resolvable:$false] %s1769_s14 }
  0xa3   : > { %s1771_s1 = scalar_lea.vmem %s1770_s14, 256  ;;  %p1772_p3 = scmp.lt.s32.totalorder %s392_s7, %s1770_s14 }
  0xa4   : > { %p1767_p7 = pnand %p1765_p0, %p2104_p12  ;;  %p1773_p13 = scmp.lt.s32.totalorder %s1771_s1, %s1764_s26 }
  0xa6   : > { %p1768_p8 = pneg %p1767_p7  ;;  %p1774_p9 = por %p1773_p13, %p1772_p3 }
  0xa8   : > { %p1775_p4 = pnand %p1774_p9, %p1768_p8 }
  0xaa   : > { %1778 = shalt.err (!%p1775_p4)
}
  0xab   : > { %p2497_p6 = scmp.ne.s32.totalorder %s2483_s21, 0  ;;  %p2498_p2 = scmp.ne.s32.totalorder %s2482_s18, 0 }
  0xac   : > { %s2230_s12 = sand.u32 (!%p2498_p2), 1, %s1889_s28   ;;  %p2499_p12 = scmp.ne.s32.totalorder (!%p2498_p2), %s2478_s15, 0 }
  0xad   : > { %1550 = dma.hbm_to_vmem [thread:$0]  (!%p2497_p6), %s2206_s23, 128, %s392_s7, %s380_s24  }
  0xae   : > { %400 = sbr.rel (%p2498_p2) target bundleno = 1030 (0x406), region = 48  ;;  %s1393_s19 = sshll.u32 (!%p2498_p2), %s2230_s12, 4 }
  0xaf   : > { %s403_s27 = scalar_lea.sflag (!%p2498_p2), [#allocation3], %s2230_s12  ;;  %s2234_s0 = scalar_lea.vmem (!%p2498_p2), [#allocation2], %s1393_s19 }
  0xb5   : > { %1860 = dma.done.wait (%p2499_p12), %s403_s27, 256  }
  0xb6   : > { %1862 = vsyncadd (%p2499_p12), %s403_s27, 4294967040  ;;  %s411_s21 = sand.u32 1, %s1994_s11   ;;  %s415_s23 = scalar_lea.vmem [#allocation5], %s1393_s19 }
  0xb7   : > { %s412_s18 = scalar_lea.sflag [#allocation6], %s411_s21 }
  0xb8   : > { %1864 = dma.done.wait (%p2499_p12), %s412_s18, 512  }
  0xb9   : > { %1866 = vsyncadd (%p2499_p12), %s412_s18, 4294966784  ;;  %s2246_s7 = sshll.u32 %s2230_s12, 3  ;;  %s2248_s24 = scalar_lea.vmem [#allocation7], %s1393_s19 }
  0xba   : > { %s430_s22 = scalar_lea.sflag [#allocation9], %s411_s21  ;;  %s433_s4 = scalar_lea.vmem [#allocation8], %s2246_s7 }
  0xbb   : > { %1868 = dma.done.wait (%p2499_p12), %s430_s22, 128  }
  0xbc   : > { %1870 = vsyncadd (%p2499_p12), %s430_s22, 4294967168  ;;  %p2500_p9 = scmp.eq.s32.totalorder %s1994_s11, 0 }
  0xbe   : > { %1872 = dma.done.wait (%p2500_p9), [#allocation9], 128   ;;  %p2501_p5 = pmov %p2500_p9 }
  0xbf   : > { %v1914_v0 = vmov 0.0   ;;  %vm1915_vm0 = vmmov 0   ;;  %vm508_vm1 = vcmask 1043456   ;;  %v495_v1 = vld [vmem:[%s415_s23] sm:$0xf]  ;;  %vm504_vm2 = vcmask 64512  }
  0xc0   : > { %1874 = vsyncadd (%p2501_p5), [#allocation9], 4294967168  ;;  %1446 = vmatprep.subr.bf16.mxu0 %v1914_v0  ;;  %1452 = vmatprep.subr.bf16.mxu1 %v1914_v0  ;;  %v496_v2 = vld [vmem:[%s415_s23 + $0x4] sm:$0xf]  ;;  %v510_v3 = vsel %vm508_vm1, %v495_v1, 0  ;;  %s489_s29 = scalar_lea.vmem [#allocation12], %s2246_s7 }
  0xc1   : > { %1448 = vmatprep.mubr.msk.bf16.mxu0 %vm1915_vm0, %v1914_v0  ;;  %1454 = vmatprep.mubr.msk.bf16.mxu1 %vm1915_vm0, %v1914_v0  ;;  %v556_v4 = vsel %vm508_vm1, %v496_v2, 0  ;;  %v497_v5 = vld [vmem:[%s415_s23 + $0x8] sm:$0xf]  ;;  %v491_v6 = vld [vmem:[%s2234_s0] sm:$0xf]  ;;  %s1415_s1 = sshll.u32 %s1897_s30, 7 }
  0xc2   : > { %1447 = vmatpush3.bf16.msra.mxu0 %v510_v3  ;;  %1453 = vmatpush3.bf16.msra.mxu1 %v556_v4  ;;  %v492_v7 = vld [vmem:[%s2234_s0 + $0x4] sm:$0xf]  ;;  %v498_v8 = vld [vmem:[%s415_s23 + $0xc] sm:$0xf]  ;;  %v602_v9 = vsel %vm508_vm1, %v497_v5, 0  ;;  %s1184_s21 = sshll.u32 %s489_s29, 4  ;;  %s1185_s21 = int_to_ptr.vmem [resolvable:$true] %s1184_s21 }
  0xc3   : > { %1458 = vmatprep.subr.bf16.mxu0 %v1914_v0  ;;  %1464 = vmatprep.subr.bf16.mxu1 %v1914_v0  ;;  %v648_v10 = vsel %vm508_vm1, %v498_v8, 0  ;;  %v493_v11 = vld [vmem:[%s2234_s0 + $0x8] sm:$0xf]  ;;  %v494_v12 = vld [vmem:[%s2234_s0 + $0xc] sm:$0xf]  ;;  %v503_v13 = vld [vmem:[#allocation10] sm:$0xff]  ;;  %s2361_s0 = scalar_lea.hbm %s2456_s8, %s1415_s1 }
  0xc4   : > { %v499_v38 = vld [vmem:[%s2248_s24] sm:$0xf]  ;;  %v500_v40 = vld [vmem:[%s2248_s24 + $0x4] sm:$0xf]  ;;  %v501_v53 = vld [vmem:[%s2248_s24 + $0x8] sm:$0xf] }
  0xc5   : > { %1449 = vmatmul.mubr.msk.bf16.vlgmr.msra.gmra.mrb[0].mxu0 %vm504_vm2, %v491_v6  ;;  %1455 = vmatmul.mubr.msk.bf16.vlgmr.msra.gmra.mrb[0].mxu1 %vm504_vm2, %v492_v7  ;;  %v742_v39 = vsel %vm508_vm1, %v499_v38, 0  ;;  %v788_v41 = vsel %vm508_vm1, %v500_v40, 0  ;;  %v834_v58 = vsel %vm508_vm1, %v501_v53, 0  ;;  %v502_v59 = vld [vmem:[%s2248_s24 + $0xc] sm:$0xf]  ;;  %s1156_s18 = scalar_lea.sflag [#allocation13], %s2230_s12 }
  0xc6   : > { %1459 = vmatpush3.bf16.msra.mxu0 %v602_v9  ;;  %1465 = vmatpush3.bf16.msra.mxu1 %v648_v10  ;;  %v880_v63 = vsel %vm508_vm1, %v502_v59, 0  ;;  %v943_v7 = vld [vmem:[%s2453_s5] sm:$0xf]  ;;  %v944_v9 = vld [vmem:[%s2453_s5 + $0x4] sm:$0xf]  ;;  %s1779_s23 = scalar_lea.vmem %s1185_s21, 128 }
  0xc7   : > { %1460 = vmatprep.mubr.msk.bf16.mxu0 %vm1915_vm0, %v1914_v0  ;;  %1466 = vmatprep.mubr.msk.bf16.mxu1 %vm1915_vm0, %v1914_v0  ;;  %v951_v8 = vsel %vm508_vm1, %v943_v7, 0  ;;  %v997_v10 = vsel %vm508_vm1, %v944_v9, 0  ;;  %v946_v40 = vld [vmem:[%s2453_s5 + $0xc] sm:$0xf]  ;;  %p1780_p11 = scmp.ne.s32.totalorder %s1185_s21, %s1779_s23  ;;  %p2502_p1 = scmp.ne.s32.totalorder %s2479_s16, 0 }
  0xc8   : > { %1470 = vmatprep.subr.bf16.mxu0 %v1914_v0  ;;  %1476 = vmatprep.subr.bf16.mxu1 %v1914_v0  ;;  %s1916_s24 = smov [#allocation12]  }
  0xc9   : > { %p1781_p10 = pnand %p1780_p11, %p2502_p1  ;;  %s1783_s22 = sshll.u32 %s1916_s24, 4  ;;  %s1784_s22 = int_to_ptr.vmem [resolvable:$false] %s1783_s22 }
  0xca   : > { %s1785_s11 = scalar_lea.vmem %s1784_s22, 256  ;;  %p1786_p7 = scmp.lt.s32.totalorder %s1185_s21, %s1784_s22 }
  0xcb   : > { %p1782_p0 = pneg %p1781_p10  ;;  %p1787_p8 = scmp.lt.s32.totalorder %s1785_s11, %s1779_s23 }
  0xcd   : > { %1461 = vmatmul.mubr.msk.bf16.vlgmr.msra.gmra.mrb[4].mxu0 %vm504_vm2, %v493_v11  ;;  %1467 = vmatmul.mubr.msk.bf16.vlgmr.msra.gmra.mrb[4].mxu1 %vm504_vm2, %v494_v12  ;;  %p1788_p3 = por %p1787_p8, %p1786_p7 }
  0xce   : > { %1472 = vmatprep.mubr.msk.bf16.mxu0 %vm1915_vm0, %v1914_v0  ;;  %1478 = vmatprep.mubr.msk.bf16.mxu1 %vm1915_vm0, %v1914_v0 }
  0xcf   : > { %1471 = vmatpush3.bf16.msra.mxu0 %v742_v39  ;;  %1477 = vmatpush3.bf16.msra.mxu1 %v788_v41  ;;  %p1789_p13 = pnand %p1788_p3, %p1782_p0 }
  0xd0   : > { %1482 = vmatprep.subr.bf16.mxu0 %v1914_v0  ;;  %1488 = vmatprep.subr.bf16.mxu1 %v1914_v0 }
 0x198   : > { %v546_v14 = vpop.f32.mrb[0].mxu0  ;;  %v592_v15 = vpop.f32.mrb[0].mxu1 }
 0x199   : > { %v547_v16 = vadd.f32 %v546_v14, %v503_v13  ;;  %v1450_v17 = vpop.f32.mrb[1].mxu0  ;;  %v593_v18 = vadd.f32 %v592_v15, %v503_v13  ;;  %v1456_v19 = vpop.f32.mrb[1].mxu1 }
 0x19a   : > { %v549_v20 = vpop.f32.mrb[2].mxu0  ;;  %v595_v21 = vpop.f32.mrb[2].mxu1 }
 0x19b   : > { %v1451_v22 = vpop.f32.mrb[3].mxu0  ;;  %v690_v23 = vsel %vm504_vm2, %v547_v16, -inf  ;;  %v1457_v24 = vpop.f32.mrb[3].mxu1  ;;  %v693_v25 = vsel %vm504_vm2, %v593_v18, -inf }
 0x19c   : > { %691 = vmax.xlane.f32.xlu0 %v690_v23 }
 0x1a0   : > { %694 = vmax.xlane.f32.xlu0 %v693_v25  ;;  %v638_v26 = vpop.f32.mrb[4].mxu0  ;;  %v684_v27 = vpop.f32.mrb[4].mxu1 }
 0x1a1   : > { %v639_v28 = vadd.f32 %v638_v26, %v503_v13  ;;  %v1462_v29 = vpop.f32.mrb[5].mxu0  ;;  %v685_v30 = vadd.f32 %v684_v27, %v503_v13  ;;  %v1468_v31 = vpop.f32.mrb[5].mxu1 }
 0x1a2   : > { %v641_v32 = vpop.f32.mrb[6].mxu0  ;;  %v687_v33 = vpop.f32.mrb[6].mxu1 }
 0x1a3   : > { %v1463_v34 = vpop.f32.mrb[7].mxu0  ;;  %v696_v35 = vsel %vm504_vm2, %v639_v28, -inf  ;;  %v1469_v36 = vpop.f32.mrb[7].mxu1  ;;  %v699_v37 = vsel %vm504_vm2, %v685_v30, -inf  ;;  %v945_v32 = vld [vmem:[%s2453_s5 + $0x8] sm:$0xf] }
 0x1a4   : > { %697 = vmax.xlane.f32.xlu1 %v696_v35  ;;  %v1043_v38 = vsel %vm508_vm1, %v945_v32, 0 }
 0x1a8   : > { %700 = vmax.xlane.f32.xlu1 %v699_v37 }
 0x229   : > { %v692_v42 = vpop.xlane.xlu0 %691 }
 0x22a   : > { %v702_v43 = vsub.f32 %v547_v16, %v692_v42 }
 0x22c   : > { %v706_v44 = vmul.f32 1.442695, %v702_v43 }
 0x22d   : > { %v695_v45 = vpop.xlane.xlu0 %694 }
 0x22e   : > { %1615 = vpow2.f32 %v706_v44  ;;  %v703_v46 = vsub.f32 %v593_v18, %v695_v45 }
 0x230   : > { %v708_v47 = vmul.f32 1.442695, %v703_v46  ;;  %v1089_v46 = vsel %vm508_vm1, %v946_v40, 0 }
 0x231   : > { %v698_v48 = vpop.xlane.xlu1 %697 }
 0x232   : > { %1617 = vpow2.f32 %v708_v47  ;;  %v704_v49 = vsub.f32 %v639_v28, %v698_v48 }
 0x234   : > { %v710_v50 = vmul.f32 1.442695, %v704_v49 }
 0x235   : > { %v701_v51 = vpop.xlane.xlu1 %700 }
 0x236   : > { %1619 = vpow2.f32 %v710_v50  ;;  %v705_v52 = vsub.f32 %v685_v30, %v701_v51 }
 0x238   : > { %v1616_v54 = vpop.eup %1615  ;;  %v712_v55 = vmul.f32 1.442695, %v705_v52 }
 0x239   : > { %v714_v56 = vsel %vm504_vm2, %v1616_v54, 0.0  ;;  %v734_v57 = vpack.c.bf16 %v1616_v54, %v1616_v54 }
 0x23a   : > { %1621 = vpow2.f32 %v712_v55  ;;  %715 = vadd.xlane.f32.xlu0 %v714_v56 }
 0x23b   : > { %1473 = vmatmul.mubr.msk.bf16.vlgmr.msra.gmra.mrb[8].mxu0 %vm504_vm2, %v734_v57 }
 0x23c   : > { %v1618_v60 = vpop.eup %1617  ;;  %1483 = vmatpush3.bf16.msra.mxu0 %v834_v58  ;;  %1484 = vmatprep.mubr.msk.bf16.mxu0 %vm1915_vm0, %v1914_v0 }
 0x23d   : > { %v717_v61 = vsel %vm504_vm2, %v1618_v60, 0.0  ;;  %v735_v62 = vpack.c.bf16 %v1618_v60, %v1618_v60  ;;  %1494 = vmatprep.subr.bf16.mxu0 %v1914_v0 }
 0x23e   : > { %718 = vadd.xlane.f32.xlu1 %v717_v61 }
 0x23f   : > { %1479 = vmatmul.mubr.msk.bf16.vlgmr.msra.gmra.mrb[8].mxu1 %vm504_vm2, %v735_v62 }
 0x240   : > { %v1620_v1 = vpop.eup %1619  ;;  %1489 = vmatpush3.bf16.msra.mxu1 %v880_v63  ;;  %1490 = vmatprep.mubr.msk.bf16.mxu1 %vm1915_vm0, %v1914_v0 }
 0x241   : > { %v720_v2 = vsel %vm504_vm2, %v1620_v1, 0.0  ;;  %v736_v3 = vpack.c.bf16 %v1620_v1, %v1620_v1  ;;  %1500 = vmatprep.subr.bf16.mxu1 %v1914_v0 }
 0x242   : > { %721 = vadd.xlane.f32.xlu0 %v720_v2 }
 0x243   : > { %1485 = vmatmul.mubr.msk.bf16.vlgmr.msra.gmra.mrb[12].mxu0 %vm504_vm2, %v736_v3 }
 0x244   : > { %v1622_v4 = vpop.eup %1621  ;;  %1496 = vmatprep.mubr.msk.bf16.mxu0 %vm1915_vm0, %v1914_v0  ;;  %1495 = vmatpush3.bf16.msra.mxu0 %v951_v8 }
 0x245   : > { %v723_v5 = vsel %vm504_vm2, %v1622_v4, 0.0  ;;  %v737_v6 = vpack.c.bf16 %v1622_v4, %v1622_v4  ;;  %1506 = vmatprep.subr.bf16.mxu0 %v1914_v0 }
 0x246   : > { %724 = vadd.xlane.f32.xlu1 %v723_v5 }
 0x247   : > { %1491 = vmatmul.mubr.msk.bf16.vlgmr.msra.gmra.mrb[12].mxu1 %vm504_vm2, %v737_v6 }
 0x248   : > { %1502 = vmatprep.mubr.msk.bf16.mxu1 %vm1915_vm0, %v1914_v0  ;;  %1501 = vmatpush3.bf16.msra.mxu1 %v997_v10 }
 0x249   : > { %1512 = vmatprep.subr.bf16.mxu1 %v1914_v0 }
 0x2c7   : > { %v716_v11 = vpop.xlane.xlu0 %715 }
 0x2c8   : > { %1623 = vrcp.f32 %v716_v11 }
 0x2cb   : > { %v719_v12 = vpop.xlane.xlu1 %718 }
 0x2cc   : > { %1625 = vrcp.f32 %v719_v12 }
 0x2cf   : > { %v722_v13 = vpop.xlane.xlu0 %721 }
 0x2d0   : > { %1627 = vrcp.f32 %v722_v13 }
 0x2d2   : > { %v1624_v15 = vpop.eup %1623 }
 0x2d3   : > { %v725_v14 = vpop.xlane.xlu1 %724  ;;  %v926_v18 = vmul.f32 %v1624_v15, %v1616_v54 }
 0x2d4   : > { %1629 = vrcp.f32 %v725_v14 }
 0x2d5   : > { %v930_v22 = vsel %vm504_vm2, %v926_v18, 0.0 }
 0x2d6   : > { %v1626_v16 = vpop.eup %1625 }
 0x2d7   : > { %v927_v17 = vmul.f32 %v1626_v16, %v1618_v60 }
 0x2d9   : > { %v931_v20 = vsel %vm504_vm2, %v927_v17, 0.0 }
 0x2da   : > { %v1628_v19 = vpop.eup %1627  ;;  %v932_v25 = vadd.f32 %v931_v20, %v930_v22 }
 0x2db   : > { %v928_v21 = vmul.f32 %v1628_v19, %v1620_v1 }
 0x2dd   : > { %v933_v23 = vsel %vm504_vm2, %v928_v21, 0.0 }
 0x2de   : > { %v1630_v24 = vpop.eup %1629  ;;  %v934_v27 = vadd.f32 %v933_v23, %v932_v25 }
 0x2df   : > { %v929_v26 = vmul.f32 %v1630_v24, %v1622_v4 }
 0x2e1   : > { %v935_v28 = vsel %vm504_vm2, %v929_v26, 0.0 }
 0x2e2   : > { %v936_v29 = vadd.f32 %v935_v28, %v934_v27 }
 0x2e4   : > { %v937_v30 = vmul.f32 0.25, %v936_v29 }
 0x2e6   : > { %938 = vst.msk [vmem:[%s489_s29] sm:$0xff] %vm504_vm2, %v937_v30 }
 0x30e   : > { %v778_v31 = vpop.f32.mrb[8].mxu0 }
 0x30f   : > { %v922_v33 = vmul.f32 %v1624_v15, %v778_v31  ;;  %v1474_v34 = vpop.f32.mrb[9].mxu0 }
 0x310   : > { %v781_v35 = vpop.f32.mrb[10].mxu0 }
 0x311   : > { %v939_v36 = vpack.c.bf16 %v922_v33, %v922_v33  ;;  %v1475_v37 = vpop.f32.mrb[11].mxu0 }
 0x312   : > { %v824_v39 = vpop.f32.mrb[8].mxu1 }
 0x313   : > { %v923_v41 = vmul.f32 %v1626_v16, %v824_v39  ;;  %v1480_v42 = vpop.f32.mrb[9].mxu1  ;;  %1497 = vmatmul.mubr.msk.bf16.vlgmr.msra.gmra.mrb[16].mxu0 %vm504_vm2, %v939_v36 }
 0x314   : > { %v827_v43 = vpop.f32.mrb[10].mxu1  ;;  %1507 = vmatpush3.bf16.msra.mxu0 %v1043_v38  ;;  %1508 = vmatprep.mubr.msk.bf16.mxu0 %vm1915_vm0, %v1914_v0 }
 0x315   : > { %v940_v44 = vpack.c.bf16 %v923_v41, %v923_v41  ;;  %v1481_v45 = vpop.f32.mrb[11].mxu1 }
 0x316   : > { %v870_v47 = vpop.f32.mrb[12].mxu0 }
 0x317   : > { %v924_v48 = vmul.f32 %v1628_v19, %v870_v47  ;;  %v1486_v49 = vpop.f32.mrb[13].mxu0  ;;  %1503 = vmatmul.mubr.msk.bf16.vlgmr.msra.gmra.mrb[16].mxu1 %vm504_vm2, %v940_v44 }
 0x318   : > { %v873_v50 = vpop.f32.mrb[14].mxu0  ;;  %1513 = vmatpush3.bf16.msra.mxu1 %v1089_v46  ;;  %1514 = vmatprep.mubr.msk.bf16.mxu1 %vm1915_vm0, %v1914_v0 }
 0x319   : > { %v941_v51 = vpack.c.bf16 %v924_v48, %v924_v48  ;;  %v1487_v52 = vpop.f32.mrb[15].mxu0 }
 0x31a   : > { %v916_v53 = vpop.f32.mrb[12].mxu1 }
 0x31b   : > { %v925_v54 = vmul.f32 %v1630_v24, %v916_v53  ;;  %v1492_v55 = vpop.f32.mrb[13].mxu1  ;;  %1509 = vmatmul.mubr.msk.bf16.vlgmr.msra.gmra.mrb[20].mxu0 %vm504_vm2, %v941_v51 }
 0x31c   : > { %v919_v56 = vpop.f32.mrb[14].mxu1 }
 0x31d   : > { %v942_v57 = vpack.c.bf16 %v925_v54, %v925_v54  ;;  %v1493_v58 = vpop.f32.mrb[15].mxu1 }
 0x31f   : > { %1515 = vmatmul.mubr.msk.bf16.vlgmr.msra.gmra.mrb[20].mxu1 %vm504_vm2, %v942_v57 }
 0x320   : > { %1792 = shalt.err (!%p1789_p13)
}
 0x321   : > { %s1793_s15 = scalar_lea.hbm %s2361_s0, 128  ;;  %s1797_s29 = scalar_lea.hbm %s2456_s8, 256 }
 0x322   : > { %p1794_p4 = scmp.ne.s32.totalorder %s2361_s0, %s1793_s15  ;;  %p1798_p12 = scmp.lt.u32.totalorder %s2361_s0, %s2456_s8 }
 0x323   : > { %p1799_p9 = scmp.lt.u32.totalorder %s1797_s29, %s1793_s15  ;;  %p1801_p11 = scmp.lt.u32.totalorder %s1793_s15, %s2361_s0 }
 0x324   : > { %p1795_p6 = pnand %p1794_p4, %p2502_p1 }
 0x325   : > { %p1800_p5 = por %p1799_p9, %p1798_p12 }
 0x326   : > { %p1796_p2 = pneg %p1795_p6 }
 0x327   : > { %p1802_p10 = por %p1801_p11, %p1800_p5 }
 0x329   : > { %p1803_p0 = pnand %p1802_p10, %p1796_p2 }
 0x32b   : > { %1806 = shalt.err (!%p1803_p0)
}
 0x32c   : > { %1531 = dma.vmem_to_hbm [thread:$0]  (%p2502_p1), %s1185_s21, 128, %s2361_s0, %s1156_s18   ;;  %vm1140_vm3 = vcmask 261120   ;;  %v1131_v9 = vld [vmem:[%s433_s4] sm:$0xff] }
 0x32d   : > { %v1412_v10 = vld [vmem:[%s2454_s6] ss:$0 sm:$0xff]  ;;  %s482_s19 = scalar_lea.vmem [#allocation11], %s2246_s7  ;;  %s2503_s21 = sld [smem:[#allocation28_spill]] }
 0x32e   : > { %v1139_v15 = vadd.f32 %v1412_v10, %v1131_v9  ;;  %s1170_s27 = sshll.u32 %s482_s19, 4  ;;  %s1151_s23 = scalar_lea.sflag [#allocation4], %s2230_s12  ;;  %s2400_s27 = int_to_ptr.vmem [resolvable:$true] %s1170_s27 }
 0x32f   : > { %s1807_s7 = scalar_lea.vmem %s2400_s27, 128  ;;  %s1917_s24 = smov [#allocation11]  }
 0x330   : > { %p1808_p7 = scmp.ne.s32.totalorder %s2400_s27, %s1807_s7  ;;  %s1811_s30 = sshll.u32 %s1917_s24, 4  ;;  %s1812_s30 = int_to_ptr.vmem [resolvable:$false] %s1811_s30 }
 0x331   : > { %s1813_s22 = scalar_lea.vmem %s1812_s30, 256  ;;  %p1814_p13 = scmp.lt.s32.totalorder %s2400_s27, %s1812_s30 }
 0x332   : > { %p1809_p8 = pnand %p1808_p7, %p2502_p1  ;;  %p1815_p4 = scmp.lt.s32.totalorder %s1813_s22, %s1807_s7 }
 0x333   : > { %s2398_s18 = scalar_lea.hbm %s2503_s21, %s1415_s1 }
 0x334   : > { %p1810_p3 = pneg %p1809_p8  ;;  %p1816_p6 = por %p1815_p4, %p1814_p13 }
 0x336   : > { %p1817_p2 = pnand %p1816_p6, %p1810_p3 }
 0x3e6   : > { %v987_v0 = vpop.f32.mrb[16].mxu0 }
 0x3e7   : > { %v1498_v59 = vpop.f32.mrb[17].mxu0  ;;  %v1141_v63 = vsel %vm1140_vm3, %v987_v0, 0.0 }
 0x3e8   : > { %v990_v60 = vpop.f32.mrb[18].mxu0 }
 0x3e9   : > { %v1499_v61 = vpop.f32.mrb[19].mxu0 }
 0x3ea   : > { %v1033_v62 = vpop.f32.mrb[16].mxu1 }
 0x3eb   : > { %v1142_v1 = vsel %vm1140_vm3, %v1033_v62, 0.0  ;;  %v1504_v2 = vpop.f32.mrb[17].mxu1 }
 0x3ec   : > { %v1143_v3 = vadd.f32 %v1142_v1, %v1141_v63  ;;  %v1036_v4 = vpop.f32.mrb[18].mxu1 }
 0x3ed   : > { %v1505_v5 = vpop.f32.mrb[19].mxu1 }
 0x3ee   : > { %v1079_v6 = vpop.f32.mrb[20].mxu0 }
 0x3ef   : > { %v1144_v7 = vsel %vm1140_vm3, %v1079_v6, 0.0  ;;  %v1510_v8 = vpop.f32.mrb[21].mxu0 }
 0x3f0   : > { %v1145_v11 = vadd.f32 %v1144_v7, %v1143_v3  ;;  %v1082_v12 = vpop.f32.mrb[22].mxu0 }
 0x3f1   : > { %v1511_v13 = vpop.f32.mrb[23].mxu0 }
 0x3f2   : > { %v1125_v14 = vpop.f32.mrb[20].mxu1 }
 0x3f3   : > { %v1146_v16 = vsel %vm1140_vm3, %v1125_v14, 0.0  ;;  %v1516_v17 = vpop.f32.mrb[21].mxu1 }
 0x3f4   : > { %v1147_v18 = vadd.f32 %v1146_v16, %v1145_v11  ;;  %v1128_v19 = vpop.f32.mrb[22].mxu1 }
 0x3f5   : > { %v1517_v20 = vpop.f32.mrb[23].mxu1 }
 0x3f6   : > { %v1148_v21 = vadd.f32 %v1147_v18, %v1139_v15 }
 0x3f8   : > { %1149 = vst.msk [vmem:[%s482_s19] sm:$0xff] %vm1140_vm3, %v1148_v21 }
 0x3f9   : > { %1820 = shalt.err (!%p1817_p2)
}
 0x3fa   : > { %s1821_s12 = scalar_lea.hbm %s2398_s18, 128  ;;  %s1825_s15 = scalar_lea.hbm %s2503_s21, 256 }
 0x3fb   : > { %p1822_p12 = scmp.ne.s32.totalorder %s2398_s18, %s1821_s12  ;;  %p1826_p11 = scmp.lt.u32.totalorder %s2398_s18, %s2503_s21 }
 0x3fc   : > { %p1827_p10 = scmp.lt.u32.totalorder %s1825_s15, %s1821_s12  ;;  %p1829_p7 = scmp.lt.u32.totalorder %s1821_s12, %s2398_s18 }
 0x3fd   : > { %p1823_p9 = pnand %p1822_p12, %p2502_p1 }
 0x3fe   : > { %p1828_p0 = por %p1827_p10, %p1826_p11 }
 0x3ff   : > { %p1824_p5 = pneg %p1823_p9 }
 0x400   : > { %p1830_p8 = por %p1829_p7, %p1828_p0 }
 0x402   : > { %p1831_p3 = pnand %p1830_p8, %p1824_p5 }
 0x404   : > { %1834 = shalt.err (!%p1831_p3)
}
 0x405   : > { %1530 = dma.vmem_to_hbm [thread:$0]  (%p2502_p1), %s2400_s27, 128, %s2398_s18, %s1151_s23  }
 0x406 PF: > { %s2504_s29 = sld [smem:[#allocation20_spill]]  ;;  %s2505_s13 = sld [smem:[#allocation22_spill]] }
 0x407   : > { %p2507_p4 = scmp.ge.s32.totalorder %s1905_s10, 2 }
 0x40c   : > { %s1196_s26 = sand.u32 1, %s2504_s29   ;;  %p2506_p13 = scmp.ne.s32.totalorder %s2505_s13, 0 }
 0x40d   : > { %s1197_s20 = scalar_lea.sflag [#allocation4], %s1196_s26 }
 0x40e   : > { %p1552_p6 = pnand %p2507_p4, %p2506_p13 }
 0x410   : > { %1876 = dma.done.wait (!%p1552_p6), %s1197_s20, 128  }
 0x411   : > { %1878 = vsyncadd (!%p1552_p6), %s1197_s20, 4294967168  ;;  %s1206_s14 = scalar_lea.sflag [#allocation13], %s1196_s26 }
 0x412   : > { %1880 = dma.done.wait (!%p1552_p6), %s1206_s14, 128  }
 0x413   : > { %1882 = vsyncadd (!%p1552_p6), %s1206_s14, 4294967168  ;;  %s34_s10 = sadd.s32 1, %s1905_s10   ;;  %s2508_s16 = sld [smem:[#allocation21_spill]] }
 0x414   : > { %p31_p2 = scmp.ge.s32.totalorder %s34_s10, 4   ;;  %s2509_s29 = sld [smem:[#allocation24_spill]] }
 0x415   : > { %s2510_s19 = sld [smem:[#allocation23_spill]]  ;;  %s2511_s27 = smov %s1889_s28 }
 0x416   : > { %s2513_s30 = smov %s1901_s9  ;;  %33 = sbr.rel (!%p31_p2) target bundleno = 17 (0x11), region = 152 }
 0x419   : > { %s2512_s28 = smov %s2508_s16 }
 0x41b   : > { %s2514_s9 = smov %s2510_s19 }
 0x41d   :  { %1211 = vsyncpa [#allocation3], 1 }
 0x41e   :  { %1213 = vsyncpa [#allocation3 + $0x1], 1 }
 0x41f   :  { %1214 = vsyncpa [#allocation6], 1 }
 0x420   :  { %1216 = vsyncpa [#allocation6 + $0x1], 1 }
 0x421   :  { %1217 = vsyncpa [#allocation9], 1 }
 0x422   :  { %1219 = vsyncpa [#allocation9 + $0x1], 1 }
 0x423   :  { %1220 = vsyncpa [#allocation4], 1 }
 0x424   :  { %1222 = vsyncpa [#allocation4 + $0x1], 1 }
 0x425   :  { %1223 = vsyncpa [#allocation13], 1 }
 0x426   :  { %1225 = vsyncpa [#allocation13 + $0x1], 1 }

</bundles_post_ra>
